<compile_context>
chip_gen: v7x
topology: tpu7x:2x2x1
jax: 0.10.0
libtpu: 0.0.40
codegen_flags: <defaults>
</compile_context>

<pallas_src>
import jax
import jax.numpy as jnp
from jax import lax
from jax.experimental import pallas as pl
from jax.experimental.pallas import tpu as pltpu

# ---------------- model config (synthetic, deterministic) ----------------
IN_HORIZON = 2
OUT_HORIZON = 2
SAMPLING_RATE = 8
INPUT_SIZE = int(IN_HORIZON * SAMPLING_RATE + OUT_HORIZON * SAMPLING_RATE)  # 32
HIDDEN = 32          # cfg.LSTM_NODES
SEQ = 8
EPS = 1e-5


def _kernel(x_ref, p_ref, out_ref, xw_ref, hseq_ref):
    """LSTM recurrence + BatchNorm1d (batch stats) + fused Linear + sigmoid."""
    S, Din = x_ref.shape
    H = p_ref.shape[1] // 4

    # ---- unpack the single parameter slab (static slices are free) ----
    wih = p_ref[0:Din, :]                                # (Din, 4H)
    whh = p_ref[Din:Din + H, :]                          # (H,   4H)
    b_gates = p_ref[Din + H:Din + H + 1, :]              # (1,   4H)  gate bias (g cols pre-scaled x2)
    w_eff = p_ref[Din + H + 1:Din + H + 2, 0:H]          # (1,   H)   gamma folded into linear weight
    b_eff = p_ref[Din + H + 1:Din + H + 2, H:H + 1]      # (1,   1)   beta @ wlin + blin

    # Input projection for all timesteps in a single MXU call; spill to VMEM
    # scratch so per-step row reads are plain loads, not vreg sublane extracts.
    xw_ref[...] = jnp.dot(x_ref[...], wih,
                          preferred_element_type=jnp.float32) + b_gates

    h = jnp.zeros((1, H), jnp.float32)
    c = jnp.zeros((1, H), jnp.float32)

    # S is small & static: fully unrolled; h/c live in vregs; whh (MXU RHS)
    # is loop-invariant and hoisted out of the unrolled loop by Mosaic.
    for t in range(S):
        gates = xw_ref[t:t + 1, :] + jnp.dot(h, whh,
                                             preferred_element_type=jnp.float32)
        s = jax.nn.sigmoid(gates)                 # one full-vreg EUP pass
        i_g = s[:, 0 * H:1 * H]                   # PyTorch gate order: i, f, g, o
        f_g = s[:, 1 * H:2 * H]
        g_g = 2.0 * s[:, 2 * H:3 * H] - 1.0       # tanh(z) via pre-scaled g columns
        o_g = s[:, 3 * H:4 * H]
        c = f_g * c + i_g * g_g
        h = o_g * jnp.tanh(c)
        hseq_ref[t:t + 1, :] = h                  # off the serial h->h chain

    hs = hseq_ref[...]
    # BatchNorm1d in training mode: batch (seq) statistics, biased variance.
    mean = jnp.mean(hs, axis=0, keepdims=True)
    var = jnp.mean((hs - mean) ** 2, axis=0, keepdims=True)
    hn = (hs - mean) * lax.rsqrt(var + EPS)

    # BN affine folded into Linear(H,1); GEMV done as VPU mul + lane reduce.
    y = jnp.sum(hn * w_eff, axis=-1, keepdims=True) + b_eff
    out_ref[...] = jax.nn.sigmoid(y)


def forward(x, prep):
    """x: (S, INPUT_SIZE) float32; prep: prepared/folded params (one slab)."""
    S = x.shape[0]
    H = HIDDEN
    out = pl.pallas_call(
        _kernel,
        out_shape=jax.ShapeDtypeStruct((S, 1), jnp.float32),
        scratch_shapes=[
            pltpu.VMEM((S, 4 * H), jnp.float32),   # xw: per-step gate pre-activations
            pltpu.VMEM((S, H), jnp.float32),       # per-step hidden states
        ],
    )(x, prep["pslab"])
    return out.reshape(-1)


# ------------- host-side parameter folding (keeps module semantics) -------------
def prepare_params(params):
    H = params["whh_t"].shape[0]
    Din = params["wih_t"].shape[0]

    # Scale the g-gate (tanh) columns by 2 so tanh(z) = 2*sigmoid(2z) - 1.
    gate_scale = jnp.ones((4 * H,), jnp.float32).at[2 * H:3 * H].set(2.0)
    wih_t = params["wih_t"] * gate_scale[None, :]
    whh_t = params["whh_t"] * gate_scale[None, :]
    bias = params["bias"][0] * gate_scale                 # (4H,)

    gamma = params["gamma"][0]                            # (H,)
    beta = params["beta"][0]                              # (H,)
    wlin = params["wlin_t"][:, 0]                         # (H,)
    blin = params["blin"][0, 0]                           # scalar
    w_eff = gamma * wlin                                  # fold BN scale
    b_eff = jnp.dot(beta, wlin) + blin                    # fold BN shift

    # Pack everything into one lane-dense (rows_padded, 4H) slab: 1 DMA for all params.
    rows = Din + H + 2
    rows_padded = int(-(-rows // 8) * 8)                  # round up to sublane multiple
    slab = jnp.zeros((rows_padded, 4 * H), jnp.float32)
    slab = slab.at[0:Din, :].set(wih_t)
    slab = slab.at[Din:Din + H, :].set(whh_t)
    slab = slab.at[Din + H, :].set(bias)
    slab = slab.at[Din + H + 1, :H].set(w_eff)
    slab = slab.at[Din + H + 1, H].set(b_eff)
    return {"pslab": slab}


# ---------------- pure-JAX reference for validation (unfolded params) ----------------
def reference(x, params):
    H = params["whh_t"].shape[0]
    wih_t, whh_t, b = params["wih_t"], params["whh_t"], params["bias"]

    def step(carry, xt):
        h, c = carry
        gates = xt @ wih_t + h @ whh_t + b[0]
        i = jax.nn.sigmoid(gates[0 * H:1 * H])
        f = jax.nn.sigmoid(gates[1 * H:2 * H])
        g = jnp.tanh(gates[2 * H:3 * H])
        o = jax.nn.sigmoid(gates[3 * H:4 * H])
        c = f * c + i * g
        h = o * jnp.tanh(c)
        return (h, c), h

    (_, _), hs = lax.scan(step, (jnp.zeros((H,)), jnp.zeros((H,))), x)
    mean = jnp.mean(hs, axis=0, keepdims=True)
    var = jnp.mean((hs - mean) ** 2, axis=0, keepdims=True)
    hn = (hs - mean) / jnp.sqrt(var + EPS)
    hn = hn * params["gamma"][0] + params["beta"][0]
    y = hn @ params["wlin_t"] + params["blin"][0]
    return jax.nn.sigmoid(y).reshape(-1)


def init_params(key, input_size, hidden):
    ks = jax.random.split(key, 8)
    scale = 1.0 / jnp.sqrt(hidden)
    w_ih = jax.random.uniform(ks[0], (4 * hidden, input_size), minval=-scale, maxval=scale)
    w_hh = jax.random.uniform(ks[1], (4 * hidden, hidden), minval=-scale, maxval=scale)
    b_ih = jax.random.uniform(ks[2], (4 * hidden,), minval=-scale, maxval=scale)
    b_hh = jax.random.uniform(ks[3], (4 * hidden,), minval=-scale, maxval=scale)
    w_lin = jax.random.uniform(ks[4], (1, hidden), minval=-scale, maxval=scale)
    b_lin = jax.random.uniform(ks[5], (1,), minval=-scale, maxval=scale)
    return {
        "wih_t": w_ih.T.astype(jnp.float32),                   # (Din, 4H)
        "whh_t": w_hh.T.astype(jnp.float32),                   # (H, 4H)
        "bias": (b_ih + b_hh).reshape(1, -1).astype(jnp.float32),
        "gamma": jnp.ones((1, hidden), jnp.float32),            # BatchNorm init
        "beta": jnp.zeros((1, hidden), jnp.float32),
        "wlin_t": w_lin.T.astype(jnp.float32),                  # (H, 1)
        "blin": b_lin.reshape(1, 1).astype(jnp.float32),
    }


if __name__ == "__main__":
    key = jax.random.PRNGKey(0)
    k_x, k_p = jax.random.split(key)
    x = jax.random.normal(k_x, (SEQ, INPUT_SIZE), dtype=jnp.float32)
    params = init_params(k_p, INPUT_SIZE, HIDDEN)
    prep = prepare_params(params)

    out = forward(x, prep)
    jax.block_until_ready(out)

    ref = reference(x, params)
    assert out.shape == (SEQ,)
    assert jnp.allclose(out, ref, atol=1e-5, rtol=1e-5), (out, ref)
    print("KERNEL_OK")
</pallas_src>

<mosaic_0001>
module attributes {stable_mosaic.version = 11 : i64} {
  func.func @_kernel(%arg0: memref<8x32xf32, #tpu.memory_space<vmem>>, %arg1: memref<72x128xf32, #tpu.memory_space<vmem>>, %arg2: memref<8x1xf32, #tpu.memory_space<vmem>>, %arg3: memref<8x128xf32, #tpu.memory_space<vmem>>, %arg4: memref<8x32xf32, #tpu.memory_space<vmem>>) attributes {dimension_semantics = [], scalar_prefetch = 0 : i64, scratch_operands = 2 : i64, tpu.core_type = #tpu.core_type<tc>} {
    %c0 = arith.constant 0 : index
    %c0_0 = arith.constant 0 : index
    %0 = vector.load %arg1[%c0, %c0_0] : memref<72x128xf32, #tpu.memory_space<vmem>>, vector<32x128xf32>
    %c32 = arith.constant 32 : index
    %c0_1 = arith.constant 0 : index
    %1 = vector.load %arg1[%c32, %c0_1] : memref<72x128xf32, #tpu.memory_space<vmem>>, vector<32x128xf32>
    %c64 = arith.constant 64 : index
    %c0_2 = arith.constant 0 : index
    %2 = vector.load %arg1[%c64, %c0_2] : memref<72x128xf32, #tpu.memory_space<vmem>>, vector<1x128xf32>
    %c65 = arith.constant 65 : index
    %c0_3 = arith.constant 0 : index
    %3 = vector.load %arg1[%c65, %c0_3] : memref<72x128xf32, #tpu.memory_space<vmem>>, vector<1x32xf32>
    %c65_4 = arith.constant 65 : index
    %c32_5 = arith.constant 32 : index
    %4 = vector.load %arg1[%c65_4, %c32_5] : memref<72x128xf32, #tpu.memory_space<vmem>>, vector<1x1xf32>
    %c0_6 = arith.constant 0 : index
    %c0_7 = arith.constant 0 : index
    %5 = vector.load %arg0[%c0_6, %c0_7] : memref<8x32xf32, #tpu.memory_space<vmem>>, vector<8x32xf32>
    %cst = arith.constant dense<0.000000e+00> : vector<8x128xf32>
    %6 = tpu.matmul %5, %0, %cst {dimension_numbers = #tpu.dot_dimension_numbers<[1], [0], [0], [1], [0, 0, 1, 1], [], []>} : vector<8x32xf32>, vector<32x128xf32>, vector<8x128xf32> -> vector<8x128xf32>
    %7 = vector.broadcast %2 : vector<1x128xf32> to vector<8x128xf32>
    %8 = arith.addf %6, %7 : vector<8x128xf32>
    %c0_8 = arith.constant 0 : index
    %c0_9 = arith.constant 0 : index
    %9 = vector.load %arg3[%c0_8, %c0_9] : memref<8x128xf32, #tpu.memory_space<vmem>>, vector<8x128xf32>
    tpu.vector_store %arg3[%c0_8, %c0_9], %8 {strides = array<i32>} : memref<8x128xf32, #tpu.memory_space<vmem>>, vector<8x128xf32>,
    %cst_10 = arith.constant 0.000000e+00 : f32
    %10 = vector.broadcast %cst_10 : f32 to vector<1x32xf32>
    %cst_11 = arith.constant 0.000000e+00 : f32
    %11 = vector.broadcast %cst_11 : f32 to vector<1x32xf32>
    %c0_12 = arith.constant 0 : index
    %c0_13 = arith.constant 0 : index
    %12 = vector.load %arg3[%c0_12, %c0_13] : memref<8x128xf32, #tpu.memory_space<vmem>>, vector<1x128xf32>
    %cst_14 = arith.constant dense<0.000000e+00> : vector<1x128xf32>
    %13 = tpu.matmul %10, %1, %cst_14 {dimension_numbers = #tpu.dot_dimension_numbers<[1], [0], [0], [1], [0, 0, 1, 1], [], []>} : vector<1x32xf32>, vector<32x128xf32>, vector<1x128xf32> -> vector<1x128xf32>
    %14 = arith.addf %12, %13 : vector<1x128xf32>
    %15 = arith.negf %14 : vector<1x128xf32>
    %16 = math.exp %15 : vector<1x128xf32>
    %cst_15 = arith.constant 1.000000e+00 : f32
    %17 = vector.broadcast %cst_15 : f32 to vector<1x128xf32>
    %18 = arith.addf %17, %16 : vector<1x128xf32>
    %19 = arith.divf %17, %18 : vector<1x128xf32>
    %20 = vector.extract_strided_slice %19 {offsets = [0, 0], sizes = [1, 32], strides = [1, 1]} : vector<1x128xf32> to vector<1x32xf32>
    %21 = vector.extract_strided_slice %19 {offsets = [0, 32], sizes = [1, 32], strides = [1, 1]} : vector<1x128xf32> to vector<1x32xf32>
    %22 = vector.extract_strided_slice %19 {offsets = [0, 64], sizes = [1, 32], strides = [1, 1]} : vector<1x128xf32> to vector<1x32xf32>
    %cst_16 = arith.constant 2.000000e+00 : f32
    %23 = vector.broadcast %cst_16 : f32 to vector<1x32xf32>
    %24 = arith.mulf %23, %22 : vector<1x32xf32>
    %cst_17 = arith.constant 1.000000e+00 : f32
    %25 = vector.broadcast %cst_17 : f32 to vector<1x32xf32>
    %26 = arith.subf %24, %25 : vector<1x32xf32>
    %27 = vector.extract_strided_slice %19 {offsets = [0, 96], sizes = [1, 32], strides = [1, 1]} : vector<1x128xf32> to vector<1x32xf32>
    %28 = arith.mulf %21, %11 : vector<1x32xf32>
    %29 = arith.mulf %20, %26 : vector<1x32xf32>
    %30 = arith.addf %28, %29 : vector<1x32xf32>
    %31 = math.tanh %30 : vector<1x32xf32>
    %32 = arith.mulf %27, %31 : vector<1x32xf32>
    %c0_18 = arith.constant 0 : index
    %c0_19 = arith.constant 0 : index
    %33 = vector.load %arg4[%c0_18, %c0_19] : memref<8x32xf32, #tpu.memory_space<vmem>>, vector<1x32xf32>
    tpu.vector_store %arg4[%c0_18, %c0_19], %32 {strides = array<i32>} : memref<8x32xf32, #tpu.memory_space<vmem>>, vector<1x32xf32>,
    %c1 = arith.constant 1 : index
    %c0_20 = arith.constant 0 : index
    %34 = vector.load %arg3[%c1, %c0_20] : memref<8x128xf32, #tpu.memory_space<vmem>>, vector<1x128xf32>
    %cst_21 = arith.constant dense<0.000000e+00> : vector<1x128xf32>
    %35 = tpu.matmul %32, %1, %cst_21 {dimension_numbers = #tpu.dot_dimension_numbers<[1], [0], [0], [1], [0, 0, 1, 1], [], []>} : vector<1x32xf32>, vector<32x128xf32>, vector<1x128xf32> -> vector<1x128xf32>
    %36 = arith.addf %34, %35 : vector<1x128xf32>
    %37 = arith.negf %36 : vector<1x128xf32>
    %38 = math.exp %37 : vector<1x128xf32>
    %cst_22 = arith.constant 1.000000e+00 : f32
    %39 = vector.broadcast %cst_22 : f32 to vector<1x128xf32>
    %40 = arith.addf %39, %38 : vector<1x128xf32>
    %41 = arith.divf %39, %40 : vector<1x128xf32>
    %42 = vector.extract_strided_slice %41 {offsets = [0, 0], sizes = [1, 32], strides = [1, 1]} : vector<1x128xf32> to vector<1x32xf32>
    %43 = vector.extract_strided_slice %41 {offsets = [0, 32], sizes = [1, 32], strides = [1, 1]} : vector<1x128xf32> to vector<1x32xf32>
    %44 = vector.extract_strided_slice %41 {offsets = [0, 64], sizes = [1, 32], strides = [1, 1]} : vector<1x128xf32> to vector<1x32xf32>
    %cst_23 = arith.constant 2.000000e+00 : f32
    %45 = vector.broadcast %cst_23 : f32 to vector<1x32xf32>
    %46 = arith.mulf %45, %44 : vector<1x32xf32>
    %cst_24 = arith.constant 1.000000e+00 : f32
    %47 = vector.broadcast %cst_24 : f32 to vector<1x32xf32>
    %48 = arith.subf %46, %47 : vector<1x32xf32>
    %49 = vector.extract_strided_slice %41 {offsets = [0, 96], sizes = [1, 32], strides = [1, 1]} : vector<1x128xf32> to vector<1x32xf32>
    %50 = arith.mulf %43, %30 : vector<1x32xf32>
    %51 = arith.mulf %42, %48 : vector<1x32xf32>
    %52 = arith.addf %50, %51 : vector<1x32xf32>
    %53 = math.tanh %52 : vector<1x32xf32>
    %54 = arith.mulf %49, %53 : vector<1x32xf32>
    %c1_25 = arith.constant 1 : index
    %c0_26 = arith.constant 0 : index
    %55 = vector.load %arg4[%c1_25, %c0_26] : memref<8x32xf32, #tpu.memory_space<vmem>>, vector<1x32xf32>
    tpu.vector_store %arg4[%c1_25, %c0_26], %54 {strides = array<i32>} : memref<8x32xf32, #tpu.memory_space<vmem>>, vector<1x32xf32>,
    %c2 = arith.constant 2 : index
    %c0_27 = arith.constant 0 : index
    %56 = vector.load %arg3[%c2, %c0_27] : memref<8x128xf32, #tpu.memory_space<vmem>>, vector<1x128xf32>
    %cst_28 = arith.constant dense<0.000000e+00> : vector<1x128xf32>
    %57 = tpu.matmul %54, %1, %cst_28 {dimension_numbers = #tpu.dot_dimension_numbers<[1], [0], [0], [1], [0, 0, 1, 1], [], []>} : vector<1x32xf32>, vector<32x128xf32>, vector<1x128xf32> -> vector<1x128xf32>
    %58 = arith.addf %56, %57 : vector<1x128xf32>
    %59 = arith.negf %58 : vector<1x128xf32>
    %60 = math.exp %59 : vector<1x128xf32>
    %cst_29 = arith.constant 1.000000e+00 : f32
    %61 = vector.broadcast %cst_29 : f32 to vector<1x128xf32>
    %62 = arith.addf %61, %60 : vector<1x128xf32>
    %63 = arith.divf %61, %62 : vector<1x128xf32>
    %64 = vector.extract_strided_slice %63 {offsets = [0, 0], sizes = [1, 32], strides = [1, 1]} : vector<1x128xf32> to vector<1x32xf32>
    %65 = vector.extract_strided_slice %63 {offsets = [0, 32], sizes = [1, 32], strides = [1, 1]} : vector<1x128xf32> to vector<1x32xf32>
    %66 = vector.extract_strided_slice %63 {offsets = [0, 64], sizes = [1, 32], strides = [1, 1]} : vector<1x128xf32> to vector<1x32xf32>
    %cst_30 = arith.constant 2.000000e+00 : f32
    %67 = vector.broadcast %cst_30 : f32 to vector<1x32xf32>
    %68 = arith.mulf %67, %66 : vector<1x32xf32>
    %cst_31 = arith.constant 1.000000e+00 : f32
    %69 = vector.broadcast %cst_31 : f32 to vector<1x32xf32>
    %70 = arith.subf %68, %69 : vector<1x32xf32>
    %71 = vector.extract_strided_slice %63 {offsets = [0, 96], sizes = [1, 32], strides = [1, 1]} : vector<1x128xf32> to vector<1x32xf32>
    %72 = arith.mulf %65, %52 : vector<1x32xf32>
    %73 = arith.mulf %64, %70 : vector<1x32xf32>
    %74 = arith.addf %72, %73 : vector<1x32xf32>
    %75 = math.tanh %74 : vector<1x32xf32>
    %76 = arith.mulf %71, %75 : vector<1x32xf32>
    %c2_32 = arith.constant 2 : index
    %c0_33 = arith.constant 0 : index
    %77 = vector.load %arg4[%c2_32, %c0_33] : memref<8x32xf32, #tpu.memory_space<vmem>>, vector<1x32xf32>
    tpu.vector_store %arg4[%c2_32, %c0_33], %76 {strides = array<i32>} : memref<8x32xf32, #tpu.memory_space<vmem>>, vector<1x32xf32>,
    %c3 = arith.constant 3 : index
    %c0_34 = arith.constant 0 : index
    %78 = vector.load %arg3[%c3, %c0_34] : memref<8x128xf32, #tpu.memory_space<vmem>>, vector<1x128xf32>
    %cst_35 = arith.constant dense<0.000000e+00> : vector<1x128xf32>
    %79 = tpu.matmul %76, %1, %cst_35 {dimension_numbers = #tpu.dot_dimension_numbers<[1], [0], [0], [1], [0, 0, 1, 1], [], []>} : vector<1x32xf32>, vector<32x128xf32>, vector<1x128xf32> -> vector<1x128xf32>
    %80 = arith.addf %78, %79 : vector<1x128xf32>
    %81 = arith.negf %80 : vector<1x128xf32>
    %82 = math.exp %81 : vector<1x128xf32>
    %cst_36 = arith.constant 1.000000e+00 : f32
    %83 = vector.broadcast %cst_36 : f32 to vector<1x128xf32>
    %84 = arith.addf %83, %82 : vector<1x128xf32>
    %85 = arith.divf %83, %84 : vector<1x128xf32>
    %86 = vector.extract_strided_slice %85 {offsets = [0, 0], sizes = [1, 32], strides = [1, 1]} : vector<1x128xf32> to vector<1x32xf32>
    %87 = vector.extract_strided_slice %85 {offsets = [0, 32], sizes = [1, 32], strides = [1, 1]} : vector<1x128xf32> to vector<1x32xf32>
    %88 = vector.extract_strided_slice %85 {offsets = [0, 64], sizes = [1, 32], strides = [1, 1]} : vector<1x128xf32> to vector<1x32xf32>
    %cst_37 = arith.constant 2.000000e+00 : f32
    %89 = vector.broadcast %cst_37 : f32 to vector<1x32xf32>
    %90 = arith.mulf %89, %88 : vector<1x32xf32>
    %cst_38 = arith.constant 1.000000e+00 : f32
    %91 = vector.broadcast %cst_38 : f32 to vector<1x32xf32>
    %92 = arith.subf %90, %91 : vector<1x32xf32>
    %93 = vector.extract_strided_slice %85 {offsets = [0, 96], sizes = [1, 32], strides = [1, 1]} : vector<1x128xf32> to vector<1x32xf32>
    %94 = arith.mulf %87, %74 : vector<1x32xf32>
    %95 = arith.mulf %86, %92 : vector<1x32xf32>
    %96 = arith.addf %94, %95 : vector<1x32xf32>
    %97 = math.tanh %96 : vector<1x32xf32>
    %98 = arith.mulf %93, %97 : vector<1x32xf32>
    %c3_39 = arith.constant 3 : index
    %c0_40 = arith.constant 0 : index
    %99 = vector.load %arg4[%c3_39, %c0_40] : memref<8x32xf32, #tpu.memory_space<vmem>>, vector<1x32xf32>
    tpu.vector_store %arg4[%c3_39, %c0_40], %98 {strides = array<i32>} : memref<8x32xf32, #tpu.memory_space<vmem>>, vector<1x32xf32>,
    %c4 = arith.constant 4 : index
    %c0_41 = arith.constant 0 : index
    %100 = vector.load %arg3[%c4, %c0_41] : memref<8x128xf32, #tpu.memory_space<vmem>>, vector<1x128xf32>
    %cst_42 = arith.constant dense<0.000000e+00> : vector<1x128xf32>
    %101 = tpu.matmul %98, %1, %cst_42 {dimension_numbers = #tpu.dot_dimension_numbers<[1], [0], [0], [1], [0, 0, 1, 1], [], []>} : vector<1x32xf32>, vector<32x128xf32>, vector<1x128xf32> -> vector<1x128xf32>
    %102 = arith.addf %100, %101 : vector<1x128xf32>
    %103 = arith.negf %102 : vector<1x128xf32>
    %104 = math.exp %103 : vector<1x128xf32>
    %cst_43 = arith.constant 1.000000e+00 : f32
    %105 = vector.broadcast %cst_43 : f32 to vector<1x128xf32>
    %106 = arith.addf %105, %104 : vector<1x128xf32>
    %107 = arith.divf %105, %106 : vector<1x128xf32>
    %108 = vector.extract_strided_slice %107 {offsets = [0, 0], sizes = [1, 32], strides = [1, 1]} : vector<1x128xf32> to vector<1x32xf32>
    %109 = vector.extract_strided_slice %107 {offsets = [0, 32], sizes = [1, 32], strides = [1, 1]} : vector<1x128xf32> to vector<1x32xf32>
    %110 = vector.extract_strided_slice %107 {offsets = [0, 64], sizes = [1, 32], strides = [1, 1]} : vector<1x128xf32> to vector<1x32xf32>
    %cst_44 = arith.constant 2.000000e+00 : f32
    %111 = vector.broadcast %cst_44 : f32 to vector<1x32xf32>
    %112 = arith.mulf %111, %110 : vector<1x32xf32>
    %cst_45 = arith.constant 1.000000e+00 : f32
    %113 = vector.broadcast %cst_45 : f32 to vector<1x32xf32>
    %114 = arith.subf %112, %113 : vector<1x32xf32>
    %115 = vector.extract_strided_slice %107 {offsets = [0, 96], sizes = [1, 32], strides = [1, 1]} : vector<1x128xf32> to vector<1x32xf32>
    %116 = arith.mulf %109, %96 : vector<1x32xf32>
    %117 = arith.mulf %108, %114 : vector<1x32xf32>
    %118 = arith.addf %116, %117 : vector<1x32xf32>
    %119 = math.tanh %118 : vector<1x32xf32>
    %120 = arith.mulf %115, %119 : vector<1x32xf32>
    %c4_46 = arith.constant 4 : index
    %c0_47 = arith.constant 0 : index
    %121 = vector.load %arg4[%c4_46, %c0_47] : memref<8x32xf32, #tpu.memory_space<vmem>>, vector<1x32xf32>
    tpu.vector_store %arg4[%c4_46, %c0_47], %120 {strides = array<i32>} : memref<8x32xf32, #tpu.memory_space<vmem>>, vector<1x32xf32>,
    %c5 = arith.constant 5 : index
    %c0_48 = arith.constant 0 : index
    %122 = vector.load %arg3[%c5, %c0_48] : memref<8x128xf32, #tpu.memory_space<vmem>>, vector<1x128xf32>
    %cst_49 = arith.constant dense<0.000000e+00> : vector<1x128xf32>
    %123 = tpu.matmul %120, %1, %cst_49 {dimension_numbers = #tpu.dot_dimension_numbers<[1], [0], [0], [1], [0, 0, 1, 1], [], []>} : vector<1x32xf32>, vector<32x128xf32>, vector<1x128xf32> -> vector<1x128xf32>
    %124 = arith.addf %122, %123 : vector<1x128xf32>
    %125 = arith.negf %124 : vector<1x128xf32>
    %126 = math.exp %125 : vector<1x128xf32>
    %cst_50 = arith.constant 1.000000e+00 : f32
    %127 = vector.broadcast %cst_50 : f32 to vector<1x128xf32>
    %128 = arith.addf %127, %126 : vector<1x128xf32>
    %129 = arith.divf %127, %128 : vector<1x128xf32>
    %130 = vector.extract_strided_slice %129 {offsets = [0, 0], sizes = [1, 32], strides = [1, 1]} : vector<1x128xf32> to vector<1x32xf32>
    %131 = vector.extract_strided_slice %129 {offsets = [0, 32], sizes = [1, 32], strides = [1, 1]} : vector<1x128xf32> to vector<1x32xf32>
    %132 = vector.extract_strided_slice %129 {offsets = [0, 64], sizes = [1, 32], strides = [1, 1]} : vector<1x128xf32> to vector<1x32xf32>
    %cst_51 = arith.constant 2.000000e+00 : f32
    %133 = vector.broadcast %cst_51 : f32 to vector<1x32xf32>
    %134 = arith.mulf %133, %132 : vector<1x32xf32>
    %cst_52 = arith.constant 1.000000e+00 : f32
    %135 = vector.broadcast %cst_52 : f32 to vector<1x32xf32>
    %136 = arith.subf %134, %135 : vector<1x32xf32>
    %137 = vector.extract_strided_slice %129 {offsets = [0, 96], sizes = [1, 32], strides = [1, 1]} : vector<1x128xf32> to vector<1x32xf32>
    %138 = arith.mulf %131, %118 : vector<1x32xf32>
    %139 = arith.mulf %130, %136 : vector<1x32xf32>
    %140 = arith.addf %138, %139 : vector<1x32xf32>
    %141 = math.tanh %140 : vector<1x32xf32>
    %142 = arith.mulf %137, %141 : vector<1x32xf32>
    %c5_53 = arith.constant 5 : index
    %c0_54 = arith.constant 0 : index
    %143 = vector.load %arg4[%c5_53, %c0_54] : memref<8x32xf32, #tpu.memory_space<vmem>>, vector<1x32xf32>
    tpu.vector_store %arg4[%c5_53, %c0_54], %142 {strides = array<i32>} : memref<8x32xf32, #tpu.memory_space<vmem>>, vector<1x32xf32>,
    %c6 = arith.constant 6 : index
    %c0_55 = arith.constant 0 : index
    %144 = vector.load %arg3[%c6, %c0_55] : memref<8x128xf32, #tpu.memory_space<vmem>>, vector<1x128xf32>
    %cst_56 = arith.constant dense<0.000000e+00> : vector<1x128xf32>
    %145 = tpu.matmul %142, %1, %cst_56 {dimension_numbers = #tpu.dot_dimension_numbers<[1], [0], [0], [1], [0, 0, 1, 1], [], []>} : vector<1x32xf32>, vector<32x128xf32>, vector<1x128xf32> -> vector<1x128xf32>
    %146 = arith.addf %144, %145 : vector<1x128xf32>
    %147 = arith.negf %146 : vector<1x128xf32>
    %148 = math.exp %147 : vector<1x128xf32>
    %cst_57 = arith.constant 1.000000e+00 : f32
    %149 = vector.broadcast %cst_57 : f32 to vector<1x128xf32>
    %150 = arith.addf %149, %148 : vector<1x128xf32>
    %151 = arith.divf %149, %150 : vector<1x128xf32>
    %152 = vector.extract_strided_slice %151 {offsets = [0, 0], sizes = [1, 32], strides = [1, 1]} : vector<1x128xf32> to vector<1x32xf32>
    %153 = vector.extract_strided_slice %151 {offsets = [0, 32], sizes = [1, 32], strides = [1, 1]} : vector<1x128xf32> to vector<1x32xf32>
    %154 = vector.extract_strided_slice %151 {offsets = [0, 64], sizes = [1, 32], strides = [1, 1]} : vector<1x128xf32> to vector<1x32xf32>
    %cst_58 = arith.constant 2.000000e+00 : f32
    %155 = vector.broadcast %cst_58 : f32 to vector<1x32xf32>
    %156 = arith.mulf %155, %154 : vector<1x32xf32>
    %cst_59 = arith.constant 1.000000e+00 : f32
    %157 = vector.broadcast %cst_59 : f32 to vector<1x32xf32>
    %158 = arith.subf %156, %157 : vector<1x32xf32>
    %159 = vector.extract_strided_slice %151 {offsets = [0, 96], sizes = [1, 32], strides = [1, 1]} : vector<1x128xf32> to vector<1x32xf32>
    %160 = arith.mulf %153, %140 : vector<1x32xf32>
    %161 = arith.mulf %152, %158 : vector<1x32xf32>
    %162 = arith.addf %160, %161 : vector<1x32xf32>
    %163 = math.tanh %162 : vector<1x32xf32>
    %164 = arith.mulf %159, %163 : vector<1x32xf32>
    %c6_60 = arith.constant 6 : index
    %c0_61 = arith.constant 0 : index
    %165 = vector.load %arg4[%c6_60, %c0_61] : memref<8x32xf32, #tpu.memory_space<vmem>>, vector<1x32xf32>
    tpu.vector_store %arg4[%c6_60, %c0_61], %164 {strides = array<i32>} : memref<8x32xf32, #tpu.memory_space<vmem>>, vector<1x32xf32>,
    %c7 = arith.constant 7 : index
    %c0_62 = arith.constant 0 : index
    %166 = vector.load %arg3[%c7, %c0_62] : memref<8x128xf32, #tpu.memory_space<vmem>>, vector<1x128xf32>
    %cst_63 = arith.constant dense<0.000000e+00> : vector<1x128xf32>
    %167 = tpu.matmul %164, %1, %cst_63 {dimension_numbers = #tpu.dot_dimension_numbers<[1], [0], [0], [1], [0, 0, 1, 1], [], []>} : vector<1x32xf32>, vector<32x128xf32>, vector<1x128xf32> -> vector<1x128xf32>
    %168 = arith.addf %166, %167 : vector<1x128xf32>
    %169 = arith.negf %168 : vector<1x128xf32>
    %170 = math.exp %169 : vector<1x128xf32>
    %cst_64 = arith.constant 1.000000e+00 : f32
    %171 = vector.broadcast %cst_64 : f32 to vector<1x128xf32>
    %172 = arith.addf %171, %170 : vector<1x128xf32>
    %173 = arith.divf %171, %172 : vector<1x128xf32>
    %174 = vector.extract_strided_slice %173 {offsets = [0, 0], sizes = [1, 32], strides = [1, 1]} : vector<1x128xf32> to vector<1x32xf32>
    %175 = vector.extract_strided_slice %173 {offsets = [0, 32], sizes = [1, 32], strides = [1, 1]} : vector<1x128xf32> to vector<1x32xf32>
    %176 = vector.extract_strided_slice %173 {offsets = [0, 64], sizes = [1, 32], strides = [1, 1]} : vector<1x128xf32> to vector<1x32xf32>
    %cst_65 = arith.constant 2.000000e+00 : f32
    %177 = vector.broadcast %cst_65 : f32 to vector<1x32xf32>
    %178 = arith.mulf %177, %176 : vector<1x32xf32>
    %cst_66 = arith.constant 1.000000e+00 : f32
    %179 = vector.broadcast %cst_66 : f32 to vector<1x32xf32>
    %180 = arith.subf %178, %179 : vector<1x32xf32>
    %181 = vector.extract_strided_slice %173 {offsets = [0, 96], sizes = [1, 32], strides = [1, 1]} : vector<1x128xf32> to vector<1x32xf32>
    %182 = arith.mulf %175, %162 : vector<1x32xf32>
    %183 = arith.mulf %174, %180 : vector<1x32xf32>
    %184 = arith.addf %182, %183 : vector<1x32xf32>
    %185 = math.tanh %184 : vector<1x32xf32>
    %186 = arith.mulf %181, %185 : vector<1x32xf32>
    %c7_67 = arith.constant 7 : index
    %c0_68 = arith.constant 0 : index
    %187 = vector.load %arg4[%c7_67, %c0_68] : memref<8x32xf32, #tpu.memory_space<vmem>>, vector<1x32xf32>
    tpu.vector_store %arg4[%c7_67, %c0_68], %186 {strides = array<i32>} : memref<8x32xf32, #tpu.memory_space<vmem>>, vector<1x32xf32>,
    %c0_69 = arith.constant 0 : index
    %c0_70 = arith.constant 0 : index
    %188 = vector.load %arg4[%c0_69, %c0_70] : memref<8x32xf32, #tpu.memory_space<vmem>>, vector<8x32xf32>
    %cst_71 = arith.constant dense<0.000000e+00> : vector<32xf32>
    %189 = vector.multi_reduction <add>, %188, %cst_71 [0] : vector<8x32xf32> to vector<32xf32>
    %190 = vector.shape_cast %189 : vector<32xf32> to vector<1x32xf32>
    %cst_72 = arith.constant 8.000000e+00 : f32
    %191 = vector.broadcast %cst_72 : f32 to vector<1x32xf32>
    %192 = arith.divf %190, %191 : vector<1x32xf32>
    %193 = vector.broadcast %192 : vector<1x32xf32> to vector<8x32xf32>
    %194 = arith.subf %188, %193 : vector<8x32xf32>
    %195 = arith.mulf %194, %194 : vector<8x32xf32>
    %cst_73 = arith.constant dense<0.000000e+00> : vector<32xf32>
    %196 = vector.multi_reduction <add>, %195, %cst_73 [0] : vector<8x32xf32> to vector<32xf32>
    %197 = vector.shape_cast %196 : vector<32xf32> to vector<1x32xf32>
    %cst_74 = arith.constant 8.000000e+00 : f32
    %198 = vector.broadcast %cst_74 : f32 to vector<1x32xf32>
    %199 = arith.divf %197, %198 : vector<1x32xf32>
    %200 = vector.broadcast %192 : vector<1x32xf32> to vector<8x32xf32>
    %201 = arith.subf %188, %200 : vector<8x32xf32>
    %cst_75 = arith.constant 9.99999974E-6 : f32
    %202 = vector.broadcast %cst_75 : f32 to vector<1x32xf32>
    %203 = arith.addf %199, %202 : vector<1x32xf32>
    %204 = math.rsqrt %203 : vector<1x32xf32>
    %205 = vector.broadcast %204 : vector<1x32xf32> to vector<8x32xf32>
    %206 = arith.mulf %201, %205 : vector<8x32xf32>
    %207 = vector.broadcast %3 : vector<1x32xf32> to vector<8x32xf32>
    %208 = arith.mulf %206, %207 : vector<8x32xf32>
    %cst_76 = arith.constant dense<0.000000e+00> : vector<8xf32>
    %209 = vector.multi_reduction <add>, %208, %cst_76 [1] : vector<8x32xf32> to vector<8xf32>
    %210 = vector.shape_cast %209 : vector<8xf32> to vector<8x1xf32>
    %211 = vector.broadcast %4 : vector<1x1xf32> to vector<8x1xf32>
    %212 = arith.addf %210, %211 : vector<8x1xf32>
    %213 = arith.negf %212 : vector<8x1xf32>
    %214 = math.exp %213 : vector<8x1xf32>
    %cst_77 = arith.constant 1.000000e+00 : f32
    %215 = vector.broadcast %cst_77 : f32 to vector<8x1xf32>
    %216 = arith.addf %215, %214 : vector<8x1xf32>
    %217 = arith.divf %215, %216 : vector<8x1xf32>
    %c0_78 = arith.constant 0 : index
    %c0_79 = arith.constant 0 : index
    %218 = vector.load %arg2[%c0_78, %c0_79] : memref<8x1xf32, #tpu.memory_space<vmem>>, vector<8x1xf32>
    tpu.vector_store %arg2[%c0_78, %c0_79], %217 {strides = array<i32>} : memref<8x1xf32, #tpu.memory_space<vmem>>, vector<8x1xf32>,
    return
  }
}

</mosaic_0001>

<bundles_post_ra>
// kernel: tpu_custom_call.1
= control target key start
LH: loop header
LB: loop body
LE: loop exit
PB: predicated region body
PF: predicated region fallthrough
CT: control target
= control target key end

     0   :  { %7 = vsyncpa [#allocation5], 0  ;;  %s1515_s0 = inlined_call_operand.hbm [shape: f32[8,32], index: 0, kind: input, shape index: {}]   ;;  %s1516_s1 = inlined_call_operand.hbm [shape: f32[72,128], index: 1, kind: input, shape index: {}]   ;;  %s1517_s2 = inlined_call_operand.vmem [shape: f32[8,1], index: 2, kind: output, shape index: {}]  }
   0x1   :  { %8 = vsyncpa [#allocation7], 0  ;;  %s1348_s9 = smov [#allocation4]   ;;  %s1349_s11 = smov [#allocation6]  }
   0x2   :  { %s15_s10 = sshll.u32 %s1348_s9, 4  ;;  %s24_s12 = sshll.u32 %s1349_s11, 4  ;;  %s16_s10 = int_to_ptr.vmem [resolvable:$true] %s15_s10  ;;  %s1373_s12 = int_to_ptr.vmem [resolvable:$true] %s24_s12 }
   0x3   :  { %s1300_s15 = scalar_lea.hbm %s1515_s0, 128 }
   0x4   :  { %p1301_p0 = scmp.ne.s32.totalorder %s1515_s0, %s1300_s15  ;;  %p1304_p1 = scmp.lt.u32.totalorder %s1300_s15, %s1515_s0 }
   0x6   :  { %p1306_p2 = pnand %p1304_p1, %p1301_p0 }
   0x8   :  { %1309 = shalt.err (!%p1306_p2)
}
   0x9   :  { %s1310_s20 = scalar_lea.vmem %s16_s10, 128  ;;  %p1315_p4 = scmp.lt.s32.totalorder %s16_s10, %s16_s10 }
   0xa   :  { %p1311_p3 = scmp.ne.s32.totalorder %s16_s10, %s1310_s20  ;;  %p1316_p5 = scmp.lt.s32.totalorder %s1310_s20, %s1310_s20 }
   0xc   :  { %p1317_p6 = por %p1316_p5, %p1315_p4 }
   0xe   :  { %p1318_p7 = pnand %p1317_p6, %p1311_p3 }
  0x10   :  { %1321 = shalt.err (!%p1318_p7)
}
  0x11   :  { %18 = dma.hbm_to_vmem [thread:$0]  %s1515_s0, 128, %s16_s10, [#allocation5]  }
  0x12   :  { %s1322_s25 = scalar_lea.hbm %s1516_s1, 1152 }
  0x13   :  { %p1323_p8 = scmp.ne.s32.totalorder %s1516_s1, %s1322_s25  ;;  %p1326_p9 = scmp.lt.u32.totalorder %s1322_s25, %s1516_s1 }
  0x15   :  { %p1328_p10 = pnand %p1326_p9, %p1323_p8 }
  0x17   :  { %1331 = shalt.err (!%p1328_p10)
}
  0x18   :  { %s1332_s30 = scalar_lea.vmem %s1373_s12, 1152  ;;  %p1337_p12 = scmp.lt.s32.totalorder %s1373_s12, %s1373_s12 }
  0x19   :  { %p1333_p11 = scmp.ne.s32.totalorder %s1373_s12, %s1332_s30  ;;  %p1338_p13 = scmp.lt.s32.totalorder %s1332_s30, %s1332_s30 }
  0x1b   :  { %p1339_p0 = por %p1338_p13, %p1337_p12 }
  0x1d   :  { %p1340_p1 = pnand %p1339_p0, %p1333_p11 }
  0x1f   :  { %1343 = shalt.err (!%p1340_p1)
}
  0x20   :  { %s1350_s0 = smov 128   ;;  %s1351_s3 = smov 8  }
  0x21   :  { %30 = dma.hbm_to_vmem [thread:$0]  %s1516_s1, 1152, %s1373_s12, [#allocation7], %s1350_s0, %s1350_s0, %s1351_s3  }
  0x22   :  { %1344 = dma.done.wait [#allocation5], 128  }
  0x23   :  { %1345 = vsyncadd [#allocation5], 4294967168 }
  0x24   :  { %1346 = dma.done.wait [#allocation7], 1152  }
  0x25   :  { %1347 = vsyncadd [#allocation7], 4294966144  ;;  %v1352_v0 = vmov 0.0|0.0   ;;  %vm1353_vm0 = vmmov 0   ;;  %v1354_v1 = vmov 0.0   ;;  %v37_v2 = vld [vmem:[#allocation6] sm:$0xff] }
  0x26   :  { %1182 = vmatprep.subr.bf16.mxu0 %v1352_v0  ;;  %1091 = vmatprep.mubr.msk.f32.mxu0 %vm1353_vm0, %v1354_v1  ;;  %v38_v3 = vld [vmem:[#allocation6 + $0x8] sm:$0xff]  ;;  %v39_v4 = vld [vmem:[#allocation6 + $0x10] sm:$0xff]  ;;  %v40_v6 = vld [vmem:[#allocation6 + $0x18] sm:$0xff]  ;;  %vm52_vm1 = vcmask 261120   ;;  %s1355_s1 = smov 64   ;;  %s1356_s6 = smov 32  }
  0x27   :  { %1188 = vmatprep.subr.bf16.mxu1 %v1352_v0  ;;  %1102 = vmatprep.mubr.msk.f32.mxu1 %vm1353_vm0, %v1354_v1  ;;  %v1183_v5 = vpack.c.bf16 %v38_v3, %v37_v2  ;;  %v41_v7 = vld [vmem:[#allocation6 + $0x20] sm:$0xff]  ;;  %v42_v8 = vld [vmem:[#allocation6 + $0x28] sm:$0xff]  ;;  %v43_v9 = vld [vmem:[#allocation6 + $0x30] sm:$0xff]  ;;  %v1186_v11 = vpack.c.bf16 %v40_v6, %v39_v4  ;;  %vm231_vm2 = vcmask 253952   ;;  %s1357_s7 = smov 96   ;;  %vm1003_vm3 = vcmask 7168  }
  0x28   :  { %v44_v10 = vld [vmem:[#allocation6 + $0x38] sm:$0xff]  ;;  %v1410_v12 = vpack.c.bf16 %v42_v8, %v41_v7  ;;  %v1011_v15 = vld [vmem:[#allocation6 + $0x40] ss:$0 sm:$0xff] }
  0x29   :  { %1184 = vmatpush3.bf16.msra.mxu0 %v1183_v5  ;;  %v1414_v13 = vpack.c.bf16 %v44_v10, %v43_v9  ;;  %v47_v14 = vld [vmem:[#allocation4] sm:$0xff] }
  0x2a   :  { %1185 = vmatprep.subr.bf16.mxu0 %v1352_v0  ;;  %1190 = vmatpush3.bf16.msra.mxu1 %v1410_v12 }
  0x2b   :  { %1191 = vmatprep.subr.bf16.mxu1 %v1352_v0 }
  0x2d   :  { %1187 = vmatpush3.bf16.msra.mxu0 %v1186_v11 }
  0x2e   :  { %1194 = vmatprep.subr.bf16.mxu0 %v1352_v0  ;;  %1193 = vmatpush3.bf16.msra.mxu1 %v1414_v13 }
  0x2f   :  { %1200 = vmatprep.subr.bf16.mxu1 %v1352_v0 }
  0x30   :  { %1092 = vmatmul.mubr.msk.f32.vlgmr.msra.gmra.mrb[0].mxu0 %vm52_vm1, %v47_v14 }
  0x31   :  { %1196 = vmatpush3.bf16.msra.mxu0 %v1410_v12  ;;  %1113 = vmatprep.mubr.msk.f32.mxu0 %vm1353_vm0, %v1354_v1 }
  0x32   :  { %1103 = vmatmul.mubr.f32.vlgmr.msra.gmra.mrb[0].mxu1 %v1354_v1  ;;  %1197 = vmatprep.subr.bf16.mxu0 %v1352_v0 }
  0x33   :  { %1202 = vmatpush3.bf16.msra.mxu1 %v1410_v12  ;;  %1124 = vmatprep.mubr.msk.f32.mxu1 %vm1353_vm0, %v1354_v1 }
  0x34   :  { %1203 = vmatprep.subr.bf16.mxu1 %v1352_v0 }
  0x35   :  { %1199 = vmatpush3.bf16.msra.mxu0 %v1414_v13 }
  0x36   :  { %1206 = vmatprep.subr.bf16.mxu0 %v1352_v0 }
  0x37   :  { %1205 = vmatpush3.bf16.msra.mxu1 %v1414_v13 }
  0x38   :  { %1212 = vmatprep.subr.bf16.mxu1 %v1352_v0 }
 0x103   :  { %v122_v16 = vpop.f32.mrb[0].mxu0 }
 0x104   :  { %v123_v17 = vadd.f32 %v1011_v15, %v122_v16  ;;  %v1093_v18 = vpop.f32.mrb[1].mxu0 }
 0x105   :  { %v197_v19 = vpop.f32.mrb[0].mxu1 }
 0x106   :  { %126 = vst [vmem:[#allocation2] sm:$0xff] %v123_v17  ;;  %v1104_v20 = vpop.f32.mrb[1].mxu1 }
 0x10d   :  { %v127_v21 = vld [vmem:[#allocation2] sm:$0x1]  ;;  %v233_v38 = vld [vmem:[#allocation2 + $0x1] sm:$0x1]  ;;  %v337_v57 = vld [vmem:[#allocation2 + $0x2] sm:$0x1] }
 0x10e   :  { %v201_v22 = vadd.f32 %v197_v19, %v127_v21  ;;  %v441_v16 = vld [vmem:[#allocation2 + $0x3] sm:$0x1] }
 0x110   :  { %v1013_v23 = vmul.f32 -1.442695, %v201_v22 }
 0x112   :  { %1246 = vpow2.f32 %v1013_v23 }
 0x11c   :  { %v1247_v24 = vpop.eup %1246 }
 0x11d   :  { %v205_v25 = vadd.f32 1.0, %v1247_v24 }
 0x11f   :  { %1248 = vrcp.f32 %v205_v25 }
 0x129   :  { %v1249_v26 = vpop.eup %1248 }
 0x12a   :  { %v208_v27 = vmul.f32 2.0, %v1249_v26  ;;  %v210_v31 = vmul.f32 0.0, %v1249_v26 }
 0x12c   :  { %v1014_v28 = vadd.f32 -1.0, %v208_v27 }
 0x12e   :  { %212 = vrot.lane.b32.xlu0 %v1014_v28, %s1355_s1 }
 0x1a0   :  { %v213_v29 = vpop.permute.xlu0 %212 }
 0x1a1   :  { %v215_v30 = vmul.f32 %v1249_v26, %v213_v29 }
 0x1a3   :  { %217 = vrot.lane.b32.xlu0 %v215_v30, %s1356_s6 }
 0x215   :  { %v218_v32 = vpop.permute.xlu0 %217 }
 0x216   :  { %v220_v33 = vadd.f32 %v218_v32, %v210_v31 }
 0x218   :  { %1250 = vtanh.f32 %v220_v33 }
 0x222   :  { %v1251_v34 = vpop.eup %1250 }
 0x223   :  { %223 = vrot.lane.b32.xlu1 %v1251_v34, %s1355_s1 }
 0x295   :  { %v224_v35 = vpop.permute.xlu1 %223 }
 0x296   :  { %v226_v36 = vmul.f32 %v1249_v26, %v224_v35  ;;  %v545_v35 = vld [vmem:[#allocation2 + $0x4] sm:$0x1] }
 0x298   :  { %228 = vrot.lane.b32.xlu1 %v226_v36, %s1356_s6 }
 0x30a   :  { %v229_v37 = vpop.permute.xlu1 %228 }
 0x30b   :  { %232 = vst.msk [vmem:[#allocation3] sm:$0x1] %vm231_vm2, %v229_v37  ;;  %1114 = vmatmul.mubr.msk.f32.vlgmr.msra.gmra.mrb[2].mxu0 %vm52_vm1, %v229_v37 }
 0x30c   :  { %1208 = vmatpush3.bf16.msra.mxu0 %v1410_v12  ;;  %1135 = vmatprep.mubr.msk.f32.mxu0 %vm1353_vm0, %v1354_v1 }
 0x30d   :  { %1209 = vmatprep.subr.bf16.mxu0 %v1352_v0 }
 0x310   :  { %1211 = vmatpush3.bf16.msra.mxu0 %v1414_v13 }
 0x311   :  { %1218 = vmatprep.subr.bf16.mxu0 %v1352_v0 }
 0x3de   :  { %v302_v39 = vpop.f32.mrb[2].mxu0 }
 0x3df   :  { %v306_v40 = vadd.f32 %v302_v39, %v233_v38  ;;  %v1115_v41 = vpop.f32.mrb[3].mxu0 }
 0x3e1   :  { %v1016_v42 = vmul.f32 -1.442695, %v306_v40 }
 0x3e3   :  { %1252 = vpow2.f32 %v1016_v42 }
 0x3ed   :  { %v1253_v43 = vpop.eup %1252 }
 0x3ee   :  { %v310_v44 = vadd.f32 1.0, %v1253_v43 }
 0x3f0   :  { %1254 = vrcp.f32 %v310_v44 }
 0x3fa   :  { %v1255_v45 = vpop.eup %1254 }
 0x3fb   :  { %v313_v46 = vmul.f32 2.0, %v1255_v45  ;;  %v315_v50 = vmul.f32 %v1255_v45, %v220_v33 }
 0x3fd   :  { %v1017_v47 = vadd.f32 -1.0, %v313_v46 }
 0x3ff   :  { %317 = vrot.lane.b32.xlu0 %v1017_v47, %s1355_s1 }
 0x471   :  { %v318_v48 = vpop.permute.xlu0 %317 }
 0x472   :  { %v320_v49 = vmul.f32 %v1255_v45, %v318_v48 }
 0x474   :  { %322 = vrot.lane.b32.xlu1 %v320_v49, %s1356_s6 }
 0x4e6   :  { %v323_v51 = vpop.permute.xlu1 %322 }
 0x4e7   :  { %v325_v52 = vadd.f32 %v323_v51, %v315_v50 }
 0x4e9   :  { %1256 = vtanh.f32 %v325_v52 }
 0x4f3   :  { %v1257_v53 = vpop.eup %1256 }
 0x4f4   :  { %328 = vrot.lane.b32.xlu0 %v1257_v53, %s1355_s1 }
 0x566   :  { %v329_v54 = vpop.permute.xlu0 %328 }
 0x567   :  { %v331_v55 = vmul.f32 %v1255_v45, %v329_v54  ;;  %v649_v54 = vld [vmem:[#allocation2 + $0x5] sm:$0x1] }
 0x569   :  { %333 = vrot.lane.b32.xlu1 %v331_v55, %s1356_s6 }
 0x5db   :  { %v334_v56 = vpop.permute.xlu1 %333 }
 0x5dc   :  { %336 = vst.msk [vmem:[#allocation3 + $0x1] sm:$0x1] %vm231_vm2, %v334_v56  ;;  %1125 = vmatmul.mubr.msk.f32.vlgmr.msra.gmra.mrb[2].mxu1 %vm52_vm1, %v334_v56 }
 0x5dd   :  { %1214 = vmatpush3.bf16.msra.mxu1 %v1410_v12  ;;  %1146 = vmatprep.mubr.msk.f32.mxu1 %vm1353_vm0, %v1354_v1 }
 0x5de   :  { %1215 = vmatprep.subr.bf16.mxu1 %v1352_v0 }
 0x5e1   :  { %1217 = vmatpush3.bf16.msra.mxu1 %v1414_v13 }
 0x5e2   :  { %1224 = vmatprep.subr.bf16.mxu1 %v1352_v0 }
 0x6af   :  { %v406_v58 = vpop.f32.mrb[2].mxu1 }
 0x6b0   :  { %v410_v59 = vadd.f32 %v406_v58, %v337_v57  ;;  %v1126_v60 = vpop.f32.mrb[3].mxu1 }
 0x6b2   :  { %v1019_v61 = vmul.f32 -1.442695, %v410_v59 }
 0x6b4   :  { %1258 = vpow2.f32 %v1019_v61 }
 0x6be   :  { %v1259_v62 = vpop.eup %1258 }
 0x6bf   :  { %v414_v63 = vadd.f32 1.0, %v1259_v62 }
 0x6c1   :  { %1260 = vrcp.f32 %v414_v63 }
 0x6cb   :  { %v1261_v2 = vpop.eup %1260 }
 0x6cc   :  { %v417_v3 = vmul.f32 2.0, %v1261_v2  ;;  %v419_v7 = vmul.f32 %v1261_v2, %v325_v52 }
 0x6ce   :  { %v1020_v4 = vadd.f32 -1.0, %v417_v3 }
 0x6d0   :  { %421 = vrot.lane.b32.xlu0 %v1020_v4, %s1355_s1 }
 0x742   :  { %v422_v5 = vpop.permute.xlu0 %421 }
 0x743   :  { %v424_v6 = vmul.f32 %v1261_v2, %v422_v5 }
 0x745   :  { %426 = vrot.lane.b32.xlu1 %v424_v6, %s1356_s6 }
 0x7b7   :  { %v427_v8 = vpop.permute.xlu1 %426 }
 0x7b8   :  { %v429_v9 = vadd.f32 %v427_v8, %v419_v7  ;;  %v753_v7 = vld [vmem:[#allocation2 + $0x6] sm:$0x1] }
 0x7ba   :  { %1262 = vtanh.f32 %v429_v9 }
 0x7c4   :  { %v1263_v10 = vpop.eup %1262 }
 0x7c5   :  { %432 = vrot.lane.b32.xlu0 %v1263_v10, %s1355_s1 }
 0x837   :  { %v433_v11 = vpop.permute.xlu0 %432 }
 0x838   :  { %v435_v14 = vmul.f32 %v1261_v2, %v433_v11 }
 0x83a   :  { %437 = vrot.lane.b32.xlu1 %v435_v14, %s1356_s6 }
 0x8ac   :  { %v438_v15 = vpop.permute.xlu1 %437 }
 0x8ad   :  { %440 = vst.msk [vmem:[#allocation3 + $0x2] sm:$0x1] %vm231_vm2, %v438_v15  ;;  %1136 = vmatmul.mubr.msk.f32.vlgmr.msra.gmra.mrb[4].mxu0 %vm52_vm1, %v438_v15 }
 0x8ae   :  { %1220 = vmatpush3.bf16.msra.mxu0 %v1410_v12  ;;  %1157 = vmatprep.mubr.msk.f32.mxu0 %vm1353_vm0, %v1354_v1 }
 0x8af   :  { %1221 = vmatprep.subr.bf16.mxu0 %v1352_v0 }
 0x8b2   :  { %1223 = vmatpush3.bf16.msra.mxu0 %v1414_v13 }
 0x8b3   :  { %1230 = vmatprep.subr.bf16.mxu0 %v1352_v0 }
 0x980   :  { %v510_v17 = vpop.f32.mrb[4].mxu0 }
 0x981   :  { %v514_v18 = vadd.f32 %v510_v17, %v441_v16  ;;  %v1137_v19 = vpop.f32.mrb[5].mxu0 }
 0x983   :  { %v1022_v20 = vmul.f32 -1.442695, %v514_v18 }
 0x985   :  { %1264 = vpow2.f32 %v1022_v20 }
 0x98f   :  { %v1265_v21 = vpop.eup %1264 }
 0x990   :  { %v518_v22 = vadd.f32 1.0, %v1265_v21 }
 0x992   :  { %1266 = vrcp.f32 %v518_v22 }
 0x99c   :  { %v1267_v23 = vpop.eup %1266 }
 0x99d   :  { %v521_v24 = vmul.f32 2.0, %v1267_v23  ;;  %v523_v28 = vmul.f32 %v1267_v23, %v429_v9 }
 0x99f   :  { %v1023_v25 = vadd.f32 -1.0, %v521_v24 }
 0x9a1   :  { %525 = vrot.lane.b32.xlu0 %v1023_v25, %s1355_s1 }
 0xa13   :  { %v526_v26 = vpop.permute.xlu0 %525 }
 0xa14   :  { %v528_v27 = vmul.f32 %v1267_v23, %v526_v26 }
 0xa16   :  { %530 = vrot.lane.b32.xlu1 %v528_v27, %s1356_s6 }
 0xa88   :  { %v531_v29 = vpop.permute.xlu1 %530 }
 0xa89   :  { %v533_v30 = vadd.f32 %v531_v29, %v523_v28  ;;  %v857_v28 = vld [vmem:[#allocation2 + $0x7] sm:$0x1] }
 0xa8b   :  { %1268 = vtanh.f32 %v533_v30 }
 0xa95   :  { %v1269_v31 = vpop.eup %1268 }
 0xa96   :  { %536 = vrot.lane.b32.xlu0 %v1269_v31, %s1355_s1 }
 0xb08   :  { %v537_v32 = vpop.permute.xlu0 %536 }
 0xb09   :  { %v539_v33 = vmul.f32 %v1267_v23, %v537_v32 }
 0xb0b   :  { %541 = vrot.lane.b32.xlu1 %v539_v33, %s1356_s6 }
 0xb7d   :  { %v542_v34 = vpop.permute.xlu1 %541 }
 0xb7e   :  { %544 = vst.msk [vmem:[#allocation3 + $0x3] sm:$0x1] %vm231_vm2, %v542_v34  ;;  %1147 = vmatmul.mubr.msk.f32.vlgmr.msra.gmra.mrb[4].mxu1 %vm52_vm1, %v542_v34 }
 0xb7f   :  { %1226 = vmatpush3.bf16.msra.mxu1 %v1410_v12  ;;  %1168 = vmatprep.mubr.msk.f32.mxu1 %vm1353_vm0, %v1354_v1 }
 0xb80   :  { %1227 = vmatprep.subr.bf16.mxu1 %v1352_v0 }
 0xb83   :  { %1229 = vmatpush3.bf16.msra.mxu1 %v1414_v13 }
 0xc51   :  { %v614_v36 = vpop.f32.mrb[4].mxu1 }
 0xc52   :  { %v618_v37 = vadd.f32 %v614_v36, %v545_v35  ;;  %v1148_v38 = vpop.f32.mrb[5].mxu1 }
 0xc54   :  { %v1025_v39 = vmul.f32 -1.442695, %v618_v37 }
 0xc56   :  { %1270 = vpow2.f32 %v1025_v39 }
 0xc60   :  { %v1271_v40 = vpop.eup %1270 }
 0xc61   :  { %v622_v41 = vadd.f32 1.0, %v1271_v40 }
 0xc63   :  { %1272 = vrcp.f32 %v622_v41 }
 0xc6d   :  { %v1273_v42 = vpop.eup %1272 }
 0xc6e   :  { %v625_v43 = vmul.f32 2.0, %v1273_v42  ;;  %v627_v47 = vmul.f32 %v1273_v42, %v533_v30 }
 0xc70   :  { %v1026_v44 = vadd.f32 -1.0, %v625_v43 }
 0xc72   :  { %629 = vrot.lane.b32.xlu0 %v1026_v44, %s1355_s1 }
 0xce4   :  { %v630_v45 = vpop.permute.xlu0 %629 }
 0xce5   :  { %v632_v46 = vmul.f32 %v1273_v42, %v630_v45 }
 0xce7   :  { %634 = vrot.lane.b32.xlu1 %v632_v46, %s1356_s6 }
 0xd59   :  { %v635_v48 = vpop.permute.xlu1 %634 }
 0xd5a   :  { %v637_v49 = vadd.f32 %v635_v48, %v627_v47 }
 0xd5c   :  { %1274 = vtanh.f32 %v637_v49 }
 0xd66   :  { %v1275_v50 = vpop.eup %1274 }
 0xd67   :  { %640 = vrot.lane.b32.xlu0 %v1275_v50, %s1355_s1 }
 0xdd9   :  { %v641_v51 = vpop.permute.xlu0 %640 }
 0xdda   :  { %v643_v52 = vmul.f32 %v1273_v42, %v641_v51 }
 0xddc   :  { %645 = vrot.lane.b32.xlu1 %v643_v52, %s1356_s6 }
 0xe4e   :  { %v646_v53 = vpop.permute.xlu1 %645 }
 0xe4f   :  { %648 = vst.msk [vmem:[#allocation3 + $0x4] sm:$0x1] %vm231_vm2, %v646_v53  ;;  %1158 = vmatmul.mubr.msk.f32.vlgmr.msra.gmra.mrb[6].mxu0 %vm52_vm1, %v646_v53 }
 0xe50   :  { %1232 = vmatpush3.bf16.msra.mxu0 %v1410_v12  ;;  %1179 = vmatprep.mubr.msk.f32.mxu0 %vm1353_vm0, %v1354_v1 }
 0xe51   :  { %1233 = vmatprep.subr.bf16.mxu0 %v1352_v0 }
 0xe54   :  { %1235 = vmatpush3.bf16.msra.mxu0 %v1414_v13 }
 0xf22   :  { %v718_v55 = vpop.f32.mrb[6].mxu0 }
 0xf23   :  { %v722_v56 = vadd.f32 %v718_v55, %v649_v54  ;;  %v1159_v57 = vpop.f32.mrb[7].mxu0 }
 0xf25   :  { %v1028_v58 = vmul.f32 -1.442695, %v722_v56 }
 0xf27   :  { %1276 = vpow2.f32 %v1028_v58 }
 0xf31   :  { %v1277_v59 = vpop.eup %1276 }
 0xf32   :  { %v726_v60 = vadd.f32 1.0, %v1277_v59 }
 0xf34   :  { %1278 = vrcp.f32 %v726_v60 }
 0xf3e   :  { %v1279_v61 = vpop.eup %1278 }
 0xf3f   :  { %v729_v62 = vmul.f32 2.0, %v1279_v61  ;;  %v731_v0 = vmul.f32 %v1279_v61, %v637_v49 }
 0xf41   :  { %v1029_v63 = vadd.f32 -1.0, %v729_v62 }
 0xf43   :  { %733 = vrot.lane.b32.xlu0 %v1029_v63, %s1355_s1 }
 0xfb5   :  { %v734_v12 = vpop.permute.xlu0 %733 }
 0xfb6   :  { %v736_v1 = vmul.f32 %v1279_v61, %v734_v12 }
 0xfb8   :  { %738 = vrot.lane.b32.xlu1 %v736_v1, %s1356_s6 }
0x102a   :  { %v739_v13 = vpop.permute.xlu1 %738 }
0x102b   :  { %v741_v2 = vadd.f32 %v739_v13, %v731_v0 }
0x102d   :  { %1280 = vtanh.f32 %v741_v2 }
0x1037   :  { %v1281_v3 = vpop.eup %1280 }
0x1038   :  { %744 = vrot.lane.b32.xlu0 %v1281_v3, %s1355_s1 }
0x10aa   :  { %v745_v4 = vpop.permute.xlu0 %744 }
0x10ab   :  { %v747_v5 = vmul.f32 %v1279_v61, %v745_v4 }
0x10ad   :  { %749 = vrot.lane.b32.xlu1 %v747_v5, %s1356_s6 }
0x111f   :  { %v750_v6 = vpop.permute.xlu1 %749 }
0x1120   :  { %752 = vst.msk [vmem:[#allocation3 + $0x5] sm:$0x1] %vm231_vm2, %v750_v6  ;;  %1169 = vmatmul.mubr.msk.f32.vlgmr.msra.gmra.mrb[6].mxu1 %vm52_vm1, %v750_v6 }
0x11f3   :  { %v822_v8 = vpop.f32.mrb[6].mxu1 }
0x11f4   :  { %v826_v9 = vadd.f32 %v822_v8, %v753_v7  ;;  %v1170_v10 = vpop.f32.mrb[7].mxu1 }
0x11f6   :  { %v1031_v11 = vmul.f32 -1.442695, %v826_v9 }
0x11f8   :  { %1282 = vpow2.f32 %v1031_v11 }
0x1202   :  { %v1283_v14 = vpop.eup %1282 }
0x1203   :  { %v830_v15 = vadd.f32 1.0, %v1283_v14 }
0x1205   :  { %1284 = vrcp.f32 %v830_v15 }
0x120f   :  { %v1285_v16 = vpop.eup %1284 }
0x1210   :  { %v833_v17 = vmul.f32 2.0, %v1285_v16  ;;  %v835_v21 = vmul.f32 %v1285_v16, %v741_v2  ;;  %v1036_v2 = vld [vmem:[#allocation6 + $0x41] ss:$0 sm:$0xff] }
0x1212   :  { %v1032_v18 = vadd.f32 -1.0, %v833_v17 }
0x1214   :  { %837 = vrot.lane.b32.xlu0 %v1032_v18, %s1355_s1 }
0x1286   :  { %v838_v19 = vpop.permute.xlu0 %837 }
0x1287   :  { %v840_v20 = vmul.f32 %v1285_v16, %v838_v19 }
0x1289   :  { %842 = vrot.lane.b32.xlu1 %v840_v20, %s1356_s6 }
0x12fb   :  { %v843_v22 = vpop.permute.xlu1 %842 }
0x12fc   :  { %v845_v23 = vadd.f32 %v843_v22, %v835_v21 }
0x12fe   :  { %1286 = vtanh.f32 %v845_v23 }
0x1308   :  { %v1287_v24 = vpop.eup %1286 }
0x1309   :  { %848 = vrot.lane.b32.xlu0 %v1287_v24, %s1355_s1 }
0x137b   :  { %v849_v25 = vpop.permute.xlu0 %848 }
0x137c   :  { %v851_v26 = vmul.f32 %v1285_v16, %v849_v25 }
0x137e   :  { %853 = vrot.lane.b32.xlu1 %v851_v26, %s1356_s6 }
0x13f0   :  { %v854_v27 = vpop.permute.xlu1 %853 }
0x13f1   :  { %856 = vst.msk [vmem:[#allocation3 + $0x6] sm:$0x1] %vm231_vm2, %v854_v27  ;;  %1180 = vmatmul.mubr.msk.f32.vlgmr.msra.gmra.mrb[8].mxu0 %vm52_vm1, %v854_v27 }
0x14c4   :  { %v926_v29 = vpop.f32.mrb[8].mxu0 }
0x14c5   :  { %v930_v30 = vadd.f32 %v926_v29, %v857_v28  ;;  %v1181_v31 = vpop.f32.mrb[9].mxu0 }
0x14c7   :  { %v1034_v32 = vmul.f32 -1.442695, %v930_v30 }
0x14c9   :  { %1288 = vpow2.f32 %v1034_v32 }
0x14d3   :  { %v1289_v33 = vpop.eup %1288 }
0x14d4   :  { %v934_v34 = vadd.f32 1.0, %v1289_v33 }
0x14d6   :  { %1290 = vrcp.f32 %v934_v34 }
0x14e0   :  { %v1291_v35 = vpop.eup %1290 }
0x14e1   :  { %v937_v36 = vmul.f32 2.0, %v1291_v35  ;;  %v939_v40 = vmul.f32 %v1291_v35, %v845_v23 }
0x14e3   :  { %v1035_v37 = vadd.f32 -1.0, %v937_v36 }
0x14e5   :  { %941 = vrot.lane.b32.xlu0 %v1035_v37, %s1355_s1 }
0x1557   :  { %v942_v38 = vpop.permute.xlu0 %941 }
0x1558   :  { %v944_v39 = vmul.f32 %v1291_v35, %v942_v38 }
0x155a   :  { %946 = vrot.lane.b32.xlu1 %v944_v39, %s1356_s6 }
0x15cc   :  { %v947_v41 = vpop.permute.xlu1 %946 }
0x15cd   :  { %v949_v42 = vadd.f32 %v947_v41, %v939_v40 }
0x15cf   :  { %1292 = vtanh.f32 %v949_v42 }
0x15d9   :  { %v1293_v43 = vpop.eup %1292 }
0x15da   :  { %952 = vrot.lane.b32.xlu0 %v1293_v43, %s1355_s1 }
0x164c   :  { %v953_v44 = vpop.permute.xlu0 %952 }
0x164d   :  { %v955_v45 = vmul.f32 %v1291_v35, %v953_v44 }
0x164f   :  { %957 = vrot.lane.b32.xlu1 %v955_v45, %s1356_s6 }
0x16c1   :  { %v958_v46 = vpop.permute.xlu1 %957 }
0x16c2   :  { %960 = vst.msk [vmem:[#allocation3 + $0x7] sm:$0x1] %vm231_vm2, %v958_v46 }
0x16c9   :  { %v961_v47 = vld [vmem:[#allocation3] sm:$0xff] }
0x16ca   :  { %v962_v48 = vsel %vm52_vm1, %v961_v47, 0.0 }
0x16cb   :  { %v963_v49 = vrot.slane %v962_v48, 4 }
0x16cd   :  { %v964_v50 = vadd.f32 %v963_v49, %v962_v48 }
0x16cf   :  { %v965_v51 = vrot.slane %v964_v50, 2 }
0x16d1   :  { %v966_v52 = vadd.f32 %v965_v51, %v964_v50 }
0x16d3   :  { %v967_v53 = vrot.slane %v966_v52, 1 }
0x16d5   :  { %v968_v54 = vadd.f32 %v967_v53, %v966_v52 }
0x16d7   :  { %v970_v55 = vmul.f32 0.125, %v968_v54 }
0x16d9   :  { %v971_v56 = vsub.f32 %v961_v47, %v970_v55 }
0x16db   :  { %v972_v57 = vmul.f32 %v971_v56, %v971_v56 }
0x16dd   :  { %v973_v58 = vsel %vm52_vm1, %v972_v57, 0.0 }
0x16de   :  { %v974_v59 = vrot.slane %v973_v58, 4 }
0x16e0   :  { %v975_v60 = vadd.f32 %v974_v59, %v973_v58 }
0x16e2   :  { %v976_v61 = vrot.slane %v975_v60, 2 }
0x16e4   :  { %v977_v62 = vadd.f32 %v976_v61, %v975_v60 }
0x16e6   :  { %v978_v63 = vrot.slane %v977_v62, 1 }
0x16e8   :  { %v979_v12 = vadd.f32 %v978_v63, %v977_v62 }
0x16ea   :  { %v980_v1 = vmul.f32 0.125, %v979_v12 }
0x16ec   :  { %v981_v0 = vadd.f32 1e-05, %v980_v1 }
0x16ee   :  { %1294 = vrsqrt.f32 %v981_v0 }
0x16f8   :  { %v1295_v13 = vpop.eup %1294 }
0x16f9   :  { %v983_v3 = vmul.f32 %v1295_v13, %v971_v56 }
0x16fb   :  { %v988_v4 = vmul.f32 %v1036_v2, %v983_v3 }
0x16fd   :  { %v989_v5 = vsel %vm52_vm1, %v988_v4, 0.0 }
0x16fe   :  { %990 = vadd.xlane.f32.xlu0 %v989_v5 }
0x178b   :  { %v991_v6 = vpop.xlane.xlu0 %990 }
0x178c   :  { %v992_v7 = vadd.f32 %v1036_v2, %v991_v6 }
0x178e   :  { %v1037_v8 = vmul.f32 -1.442695, %v992_v7 }
0x1790   :  { %1296 = vpow2.f32 %v1037_v8 }
0x179a   :  { %v1297_v9 = vpop.eup %1296 }
0x179b   :  { %v996_v10 = vadd.f32 1.0, %v1297_v9 }
0x179d   :  { %1298 = vrcp.f32 %v996_v10 }
0x17a7   :  { %v1299_v11 = vpop.eup %1298 }
0x17a8   :  { %1000 = vrot.lane.b32.xlu1 %v1299_v11, %s1357_s7 }
0x181a   :  { %v1001_v14 = vpop.permute.xlu1 %1000 }
0x181b   :  { %1004 = vst.msk [vmem:[%s1517_s2] sm:$0xff] %vm1003_vm3, %v1001_v14 }
0x181c   :  { %1009 = vsyncpa [#allocation5], 1 }
0x181d   :  { %1010 = vsyncpa [#allocation7], 1 }

</bundles_post_ra>
